<compile_context>
chip_gen: v6e
topology: v6e:2x2x1
jax: 0.10.0
libtpu: 0.0.40
codegen_flags: <defaults>
</compile_context>

<pallas_src>
import jax
import jax.numpy as jnp
from jax.experimental import pallas as pl
from jax.experimental.pallas import tpu as pltpu

EPS = 1e-5
F32 = jnp.float32
BF16 = jnp.bfloat16


def _shifted_taps(x, zrow):
    """[x[h-1] | x[h] | x[h+1]] stacked along lanes with zero rows at the image
    borders -> (H, 3K). One stacked-tap operand so the conv's three vertical
    taps become a single K-stacked MXU matmul."""
    up = jnp.concatenate([zrow, x[:-1, :]], axis=0)
    dn = jnp.concatenate([x[1:, :], zrow], axis=0)
    return jnp.concatenate([up, x, dn], axis=1)


def stage1_kernel(x_ref, a1_ref, b1_ref, y1_ref, st_ref):
    """conv1 (3x3 'same') for one image + BN1 sum/sumsq accumulation."""
    @pl.when(pl.program_id(0) == 0)
    def _():
        st_ref[...] = jnp.zeros_like(st_ref)

    x = x_ref[...]                                       # (H, W*Cin) bf16
    zrow = jnp.zeros((1, x.shape[1]), x.dtype)
    xcat = _shifted_taps(x, zrow)                        # (H, 3*W*Cin) bf16
    y1 = jnp.dot(xcat, a1_ref[...],
                 preferred_element_type=F32) + b1_ref[...]   # (H, L) f32
    y1_ref[...] = y1

    s1 = jnp.sum(y1, axis=0, keepdims=True)              # (1, L)
    s2 = jnp.sum(y1 * y1, axis=0, keepdims=True)
    st_ref[...] += jnp.concatenate([s1, s2], axis=0)     # resident accumulator


def stage2_kernel(y1_ref, sc1_ref, sh1_ref, a2_ref, b2_ref, y2_ref, st_ref):
    """BN1 affine + SiLU + conv2 for one image + BN2 sum/sumsq accumulation."""
    @pl.when(pl.program_id(0) == 0)
    def _():
        st_ref[...] = jnp.zeros_like(st_ref)

    yn = y1_ref[...] * sc1_ref[...] + sh1_ref[...]       # folded BN1 (f32)
    ya = yn * jax.nn.sigmoid(yn)                         # SiLU (f32 VPU/EUP)
    yb = ya.astype(BF16)                                 # single cast -> MXU
    zrow = jnp.zeros((1, yb.shape[1]), BF16)
    ycat = _shifted_taps(yb, zrow)                       # (H, 3L) bf16
    y2 = jnp.dot(ycat, a2_ref[...],
                 preferred_element_type=F32) + b2_ref[...]
    y2_ref[...] = y2

    s1 = jnp.sum(y2, axis=0, keepdims=True)
    s2 = jnp.sum(y2 * y2, axis=0, keepdims=True)
    st_ref[...] += jnp.concatenate([s1, s2], axis=0)


def stage3_kernel(y2_ref, sc2_ref, sh2_ref, o_ref):
    """BN2 affine + SiLU (pure elementwise; 'parallel' grid axis)."""
    yn = y2_ref[...] * sc2_ref[...] + sh2_ref[...]
    o_ref[...] = yn * jax.nn.sigmoid(yn)


def _lower_conv_weights(w_oihw, w_sp):
    """torch conv weight (Cout, Cin, 3, 3) -> banded matrices (3, W*Cin, W*Cout).

    A[dy, wi*Cin+ci, w*Cout+co] = w[co, ci, dy, wi-w+1] (0 outside the band),
    so row(h+dy-1) @ A[dy] summed over dy is the 'same' conv output row h;
    horizontal zero padding lives in the band edges."""
    cout, cin = int(w_oihw.shape[0]), int(w_oihw.shape[1])
    wt = jnp.transpose(w_oihw, (2, 3, 1, 0)).astype(F32)    # (dy, kw, ci, co)
    a = jnp.zeros((3, w_sp * cin, w_sp * cout), F32)
    for kw in range(3):
        for w in range(w_sp):
            wi = w + kw - 1
            if 0 <= wi < w_sp:
                a = a.at[:, wi * cin:(wi + 1) * cin,
                         w * cout:(w + 1) * cout].set(wt[:, kw])
    return a


def _fold_stats(stats, gamma, beta, w_sp, n_elems):
    """(2, L) per-lane sum/sumsq -> per-lane BN scale/shift rows (tiny fold,
    done once between kernels instead of chained M=1 matmuls in-kernel)."""
    cout = gamma.shape[0]
    per_c = stats.reshape(2, w_sp, cout).sum(axis=1)        # (2, Cout)
    mean = per_c[0] / n_elems
    var = jnp.maximum(per_c[1] / n_elems - mean * mean, 0.0)   # clamp >= 0
    scale = gamma.astype(F32) * jax.lax.rsqrt(var + EPS)
    shift = beta.astype(F32) - mean * scale
    tile = lambda v: jnp.tile(v, w_sp).reshape(1, w_sp * cout)
    return tile(scale), tile(shift)


@jax.jit
def basic_block(x_nchw, params):
    """Wrapper: NCHW in / NCHW out, parameters in PyTorch layouts."""
    N, Cin, H, W = x_nchw.shape
    Cout = int(params["w1"].shape[0])
    K1, L = W * Cin, W * Cout
    n_elems = float(N * H * W)

    # NCHW -> per-image row layout (N, H, W*Cin); cast to bf16 BEFORE the
    # relayout so both the transpose and the kernel input DMA move half bytes.
    xr = jnp.transpose(x_nchw.astype(BF16), (0, 2, 3, 1)).reshape(N, H, K1)

    a1 = _lower_conv_weights(params["w1"], W).reshape(3 * K1, L).astype(BF16)
    a2 = _lower_conv_weights(params["w2"], W).reshape(3 * L, L).astype(BF16)
    tile_row = lambda v: jnp.tile(v.astype(F32), W).reshape(1, L)
    b1r, b2r = tile_row(params["b1"]), tile_row(params["b2"])

    img = lambda n: (n, 0, 0)          # per-image block
    const = lambda n: (0, 0)           # resident (weights / bias / stats)
    res = lambda shape: pl.BlockSpec(shape, const)

    # ---- pass 1: conv1 + BN1 stats (grid over images; stats accumulate).
    y1, st1 = pl.pallas_call(
        stage1_kernel,
        grid=(N,),
        in_specs=[pl.BlockSpec((None, H, K1), img), res((3 * K1, L)), res((1, L))],
        out_specs=(pl.BlockSpec((None, H, L), img), res((2, L))),
        out_shape=(jax.ShapeDtypeStruct((N, H, L), F32),
                   jax.ShapeDtypeStruct((2, L), F32)),
        compiler_params=pltpu.CompilerParams(dimension_semantics=("arbitrary",)),
    )(xr, a1, b1r)

    sc1, sh1 = _fold_stats(st1, params["g1"], params["be1"], W, n_elems)

    # ---- pass 2: BN1 affine + SiLU + conv2 + BN2 stats.
    y2, st2 = pl.pallas_call(
        stage2_kernel,
        grid=(N,),
        in_specs=[pl.BlockSpec((None, H, L), img),
                  res((1, L)), res((1, L)), res((3 * L, L)), res((1, L))],
        out_specs=(pl.BlockSpec((None, H, L), img), res((2, L))),
        out_shape=(jax.ShapeDtypeStruct((N, H, L), F32),
                   jax.ShapeDtypeStruct((2, L), F32)),
        compiler_params=pltpu.CompilerParams(dimension_semantics=("arbitrary",)),
    )(y1, sc1, sh1, a2, b2r)

    sc2, sh2 = _fold_stats(st2, params["g2"], params["be2"], W, n_elems)

    # ---- pass 3: BN2 affine + SiLU (elementwise, parallel over images).
    out = pl.pallas_call(
        stage3_kernel,
        grid=(N,),
        in_specs=[pl.BlockSpec((None, H, L), img), res((1, L)), res((1, L))],
        out_specs=pl.BlockSpec((None, H, L), img),
        out_shape=jax.ShapeDtypeStruct((N, H, L), F32),
        compiler_params=pltpu.CompilerParams(dimension_semantics=("parallel",)),
    )(y2, sc2, sh2)

    # Kernel emits lane-dense NHWC rows; convert back to NCHW for API parity.
    return jnp.transpose(out.reshape(N, H, W, Cout), (0, 3, 1, 2))


def reference(x_nchw, p, matmul_dtype=jnp.bfloat16):
    """Pure-JAX reference (training-mode BN). matmul_dtype controls conv operand
    precision so the kernel (bf16-in / f32-acc MXU) can be checked tightly."""
    prec = jax.lax.Precision.HIGHEST if matmul_dtype == jnp.float32 else None

    def conv(x, w, b):
        y = jax.lax.conv_general_dilated(
            x.astype(matmul_dtype), w.astype(matmul_dtype),
            window_strides=(1, 1), padding="SAME",
            dimension_numbers=("NCHW", "OIHW", "NCHW"),
            preferred_element_type=jnp.float32, precision=prec)
        return y + b[None, :, None, None]

    def bn_silu(x, g, be):
        mean = jnp.mean(x, axis=(0, 2, 3), keepdims=True)
        var = jnp.mean(jnp.square(x - mean), axis=(0, 2, 3), keepdims=True)
        x = (x - mean) * jax.lax.rsqrt(var + EPS) * g[None, :, None, None] \
            + be[None, :, None, None]
        return x * jax.nn.sigmoid(x)

    y = bn_silu(conv(x_nchw, p["w1"], p["b1"]), p["g1"], p["be1"])
    y = bn_silu(conv(y, p["w2"], p["b2"]), p["g2"], p["be2"])
    return y


def init_params(key, in_channels, out_channels):
    """Deterministic init mirroring PyTorch defaults (kaiming-uniform a=sqrt(5))."""
    k1, k2, k3, k4 = jax.random.split(key, 4)

    def u(k, shape, fan_in):
        bound = 1.0 / float(fan_in) ** 0.5
        return jax.random.uniform(k, shape, jnp.float32, -bound, bound)

    fan1 = in_channels * 9
    fan2 = out_channels * 9
    return {
        "w1": u(k1, (out_channels, in_channels, 3, 3), fan1),
        "b1": u(k2, (out_channels,), fan1),
        "g1": jnp.ones((out_channels,), jnp.float32),
        "be1": jnp.zeros((out_channels,), jnp.float32),
        "w2": u(k3, (out_channels, out_channels, 3, 3), fan2),
        "b2": u(k4, (out_channels,), fan2),
        "g2": jnp.ones((out_channels,), jnp.float32),
        "be2": jnp.zeros((out_channels,), jnp.float32),
    }


if __name__ == "__main__":
    key = jax.random.PRNGKey(0)
    k_param, k_x = jax.random.split(key)

    N, Cin, Cout, H, W = 2, 4, 8, 16, 16
    params = init_params(k_param, Cin, Cout)
    x = jax.random.normal(k_x, (N, Cin, H, W), jnp.float32)

    out = basic_block(x, params)
    jax.block_until_ready(out)
    assert out.shape == (N, Cout, H, W), out.shape

    # Tight check vs a reference using the same bf16-operand / f32-acc convs.
    ref_bf = reference(x, params, matmul_dtype=jnp.bfloat16)
    assert jnp.allclose(out, ref_bf, atol=1e-2, rtol=1e-2), \
        float(jnp.max(jnp.abs(out - ref_bf)))

    # Loose sanity check vs full-f32 reference (gap is bf16 operand rounding).
    ref_f32 = reference(x, params, matmul_dtype=jnp.float32)
    assert jnp.allclose(out, ref_f32, atol=3e-1, rtol=3e-1), \
        float(jnp.max(jnp.abs(out - ref_f32)))

    print("KERNEL_OK")
</pallas_src>

<mosaic_0001>
module attributes {stable_mosaic.version = 11 : i64} {
  func.func @stage1_kernel(%arg0: i32, %arg1: memref<1x16x64xbf16, #tpu.memory_space<vmem>>, %arg2: memref<192x128xbf16, #tpu.memory_space<vmem>>, %arg3: memref<1x128xf32, #tpu.memory_space<vmem>>, %arg4: memref<1x16x128xf32, #tpu.memory_space<vmem>>, %arg5: memref<2x128xf32, #tpu.memory_space<vmem>>) attributes {dimension_semantics = [#tpu.dimension_semantics<arbitrary>], iteration_bounds = array<i64: 2>, scalar_prefetch = 0 : i64, scratch_operands = 0 : i64, tpu.core_type = #tpu.core_type<tc>, window_params = [{transform_indices = @transform_0, window_bounds = array<i64: 1, 16, 64>}, {pipeline_mode = #tpu.pipeline_mode<synchronous>, transform_indices = @transform_1, window_bounds = array<i64: 192, 128>}, {pipeline_mode = #tpu.pipeline_mode<synchronous>, transform_indices = @transform_2, window_bounds = array<i64: 1, 128>}, {transform_indices = @transform_3, window_bounds = array<i64: 1, 16, 128>}, {pipeline_mode = #tpu.pipeline_mode<synchronous>, transform_indices = @transform_4, window_bounds = array<i64: 2, 128>}]} {
    %c0_i32 = arith.constant 0 : i32
    %0 = arith.cmpi eq, %arg0, %c0_i32 : i32
    %1 = arith.extui %0 : i1 to i32
    %c0_i32_0 = arith.constant 0 : i32
    %2 = arith.cmpi ne, %1, %c0_i32_0 : i32
    scf.if %2 {
      %cst_17 = arith.constant 0.000000e+00 : f32
      %28 = vector.broadcast %cst_17 : f32 to vector<2x128xf32>
      %c0_18 = arith.constant 0 : index
      %c0_19 = arith.constant 0 : index
      %29 = vector.load %arg5[%c0_18, %c0_19] : memref<2x128xf32, #tpu.memory_space<vmem>>, vector<2x128xf32>
      tpu.vector_store %arg5[%c0_18, %c0_19], %28 {strides = array<i32>} : memref<2x128xf32, #tpu.memory_space<vmem>>, vector<2x128xf32>,
    } else {
    }
    %c0 = arith.constant 0 : index
    %c0_1 = arith.constant 0 : index
    %c0_2 = arith.constant 0 : index
    %3 = vector.load %arg1[%c0, %c0_1, %c0_2] : memref<1x16x64xbf16, #tpu.memory_space<vmem>>, vector<1x16x64xbf16>
    %4 = vector.shape_cast %3 : vector<1x16x64xbf16> to vector<16x64xbf16>
    %cst = arith.constant 0.000000e+00 : bf16
    %5 = vector.broadcast %cst : bf16 to vector<1x64xbf16>
    %6 = vector.extract_strided_slice %4 {offsets = [0, 0], sizes = [15, 64], strides = [1, 1]} : vector<16x64xbf16> to vector<15x64xbf16>
    %7 = tpu.concatenate %5, %6 in 0 : vector<1x64xbf16>, vector<15x64xbf16> -> vector<16x64xbf16>
    %8 = vector.extract_strided_slice %4 {offsets = [1, 0], sizes = [15, 64], strides = [1, 1]} : vector<16x64xbf16> to vector<15x64xbf16>
    %9 = tpu.concatenate %8, %5 in 0 : vector<15x64xbf16>, vector<1x64xbf16> -> vector<16x64xbf16>
    %10 = tpu.concatenate %7, %4, %9 in 1 : vector<16x64xbf16>, vector<16x64xbf16>, vector<16x64xbf16> -> vector<16x192xbf16>
    %c0_3 = arith.constant 0 : index
    %c0_4 = arith.constant 0 : index
    %11 = vector.load %arg2[%c0_3, %c0_4] : memref<192x128xbf16, #tpu.memory_space<vmem>>, vector<192x128xbf16>
    %cst_5 = arith.constant dense<0.000000e+00> : vector<16x128xf32>
    %12 = tpu.matmul %10, %11, %cst_5 {dimension_numbers = #tpu.dot_dimension_numbers<[1], [0], [0], [1], [0, 0, 1, 1], [], []>} : vector<16x192xbf16>, vector<192x128xbf16>, vector<16x128xf32> -> vector<16x128xf32>
    %c0_6 = arith.constant 0 : index
    %c0_7 = arith.constant 0 : index
    %13 = vector.load %arg3[%c0_6, %c0_7] : memref<1x128xf32, #tpu.memory_space<vmem>>, vector<1x128xf32>
    %14 = vector.broadcast %13 : vector<1x128xf32> to vector<16x128xf32>
    %15 = arith.addf %12, %14 : vector<16x128xf32>
    %c0_8 = arith.constant 0 : index
    %c0_9 = arith.constant 0 : index
    %c0_10 = arith.constant 0 : index
    %16 = vector.load %arg4[%c0_8, %c0_9, %c0_10] : memref<1x16x128xf32, #tpu.memory_space<vmem>>, vector<1x16x128xf32>
    %17 = vector.shape_cast %16 : vector<1x16x128xf32> to vector<16x128xf32>
    %18 = vector.shape_cast %15 : vector<16x128xf32> to vector<1x16x128xf32>
    tpu.vector_store %arg4[%c0_8, %c0_9, %c0_10], %18 {strides = array<i32>} : memref<1x16x128xf32, #tpu.memory_space<vmem>>, vector<1x16x128xf32>,
    %cst_11 = arith.constant dense<0.000000e+00> : vector<128xf32>
    %19 = vector.multi_reduction <add>, %15, %cst_11 [0] : vector<16x128xf32> to vector<128xf32>
    %20 = vector.shape_cast %19 : vector<128xf32> to vector<1x128xf32>
    %21 = arith.mulf %15, %15 : vector<16x128xf32>
    %cst_12 = arith.constant dense<0.000000e+00> : vector<128xf32>
    %22 = vector.multi_reduction <add>, %21, %cst_12 [0] : vector<16x128xf32> to vector<128xf32>
    %23 = vector.shape_cast %22 : vector<128xf32> to vector<1x128xf32>
    %c0_13 = arith.constant 0 : index
    %c0_14 = arith.constant 0 : index
    %24 = vector.load %arg5[%c0_13, %c0_14] : memref<2x128xf32, #tpu.memory_space<vmem>>, vector<2x128xf32>
    %25 = tpu.concatenate %20, %23 in 0 : vector<1x128xf32>, vector<1x128xf32> -> vector<2x128xf32>
    %26 = arith.addf %24, %25 : vector<2x128xf32>
    %c0_15 = arith.constant 0 : index
    %c0_16 = arith.constant 0 : index
    %27 = vector.load %arg5[%c0_15, %c0_16] : memref<2x128xf32, #tpu.memory_space<vmem>>, vector<2x128xf32>
    tpu.vector_store %arg5[%c0_15, %c0_16], %26 {strides = array<i32>} : memref<2x128xf32, #tpu.memory_space<vmem>>, vector<2x128xf32>,
    return
  }
  func.func @transform_0(%arg0: i32) -> (i32, i32, i32) {
    %c0_i32 = arith.constant 0 : i32
    %c0_i32_0 = arith.constant 0 : i32
    %c0_i32_1 = arith.constant 0 : i32
    return %arg0, %c0_i32, %c0_i32_0 : i32, i32, i32
  }
  func.func @transform_1(%arg0: i32) -> (i32, i32) {
    %c0_i32 = arith.constant 0 : i32
    %c0_i32_0 = arith.constant 0 : i32
    %c0_i32_1 = arith.constant 0 : i32
    return %c0_i32, %c0_i32_0 : i32, i32
  }
  func.func @transform_2(%arg0: i32) -> (i32, i32) {
    %c0_i32 = arith.constant 0 : i32
    %c0_i32_0 = arith.constant 0 : i32
    %c0_i32_1 = arith.constant 0 : i32
    return %c0_i32, %c0_i32_0 : i32, i32
  }
  func.func @transform_3(%arg0: i32) -> (i32, i32, i32) {
    %c0_i32 = arith.constant 0 : i32
    %c0_i32_0 = arith.constant 0 : i32
    %c0_i32_1 = arith.constant 0 : i32
    return %arg0, %c0_i32, %c0_i32_0 : i32, i32, i32
  }
  func.func @transform_4(%arg0: i32) -> (i32, i32) {
    %c0_i32 = arith.constant 0 : i32
    %c0_i32_0 = arith.constant 0 : i32
    %c0_i32_1 = arith.constant 0 : i32
    return %c0_i32, %c0_i32_0 : i32, i32
  }
}

module attributes {stable_mosaic.version = 11 : i64} {
  func.func @stage2_kernel(%arg0: i32, %arg1: memref<1x16x128xf32, #tpu.memory_space<vmem>>, %arg2: memref<1x128xf32, #tpu.memory_space<vmem>>, %arg3: memref<1x128xf32, #tpu.memory_space<vmem>>, %arg4: memref<384x128xbf16, #tpu.memory_space<vmem>>, %arg5: memref<1x128xf32, #tpu.memory_space<vmem>>, %arg6: memref<1x16x128xf32, #tpu.memory_space<vmem>>, %arg7: memref<2x128xf32, #tpu.memory_space<vmem>>) attributes {dimension_semantics = [#tpu.dimension_semantics<arbitrary>], iteration_bounds = array<i64: 2>, scalar_prefetch = 0 : i64, scratch_operands = 0 : i64, tpu.core_type = #tpu.core_type<tc>, window_params = [{transform_indices = @transform_0, window_bounds = array<i64: 1, 16, 128>}, {pipeline_mode = #tpu.pipeline_mode<synchronous>, transform_indices = @transform_1, window_bounds = array<i64: 1, 128>}, {pipeline_mode = #tpu.pipeline_mode<synchronous>, transform_indices = @transform_2, window_bounds = array<i64: 1, 128>}, {pipeline_mode = #tpu.pipeline_mode<synchronous>, transform_indices = @transform_3, window_bounds = array<i64: 384, 128>}, {pipeline_mode = #tpu.pipeline_mode<synchronous>, transform_indices = @transform_4, window_bounds = array<i64: 1, 128>}, {transform_indices = @transform_5, window_bounds = array<i64: 1, 16, 128>}, {pipeline_mode = #tpu.pipeline_mode<synchronous>, transform_indices = @transform_6, window_bounds = array<i64: 2, 128>}]} {
    %c0_i32 = arith.constant 0 : i32
    %0 = arith.cmpi eq, %arg0, %c0_i32 : i32
    %1 = arith.extui %0 : i1 to i32
    %c0_i32_0 = arith.constant 0 : i32
    %2 = arith.cmpi ne, %1, %c0_i32_0 : i32
    scf.if %2 {
      %cst_22 = arith.constant 0.000000e+00 : f32
      %41 = vector.broadcast %cst_22 : f32 to vector<2x128xf32>
      %c0_23 = arith.constant 0 : index
      %c0_24 = arith.constant 0 : index
      %42 = vector.load %arg7[%c0_23, %c0_24] : memref<2x128xf32, #tpu.memory_space<vmem>>, vector<2x128xf32>
      tpu.vector_store %arg7[%c0_23, %c0_24], %41 {strides = array<i32>} : memref<2x128xf32, #tpu.memory_space<vmem>>, vector<2x128xf32>,
    } else {
    }
    %c0 = arith.constant 0 : index
    %c0_1 = arith.constant 0 : index
    %c0_2 = arith.constant 0 : index
    %3 = vector.load %arg1[%c0, %c0_1, %c0_2] : memref<1x16x128xf32, #tpu.memory_space<vmem>>, vector<1x16x128xf32>
    %4 = vector.shape_cast %3 : vector<1x16x128xf32> to vector<16x128xf32>
    %c0_3 = arith.constant 0 : index
    %c0_4 = arith.constant 0 : index
    %5 = vector.load %arg2[%c0_3, %c0_4] : memref<1x128xf32, #tpu.memory_space<vmem>>, vector<1x128xf32>
    %6 = vector.broadcast %5 : vector<1x128xf32> to vector<16x128xf32>
    %7 = arith.mulf %4, %6 : vector<16x128xf32>
    %c0_5 = arith.constant 0 : index
    %c0_6 = arith.constant 0 : index
    %8 = vector.load %arg3[%c0_5, %c0_6] : memref<1x128xf32, #tpu.memory_space<vmem>>, vector<1x128xf32>
    %9 = vector.broadcast %8 : vector<1x128xf32> to vector<16x128xf32>
    %10 = arith.addf %7, %9 : vector<16x128xf32>
    %11 = arith.negf %10 : vector<16x128xf32>
    %12 = math.exp %11 : vector<16x128xf32>
    %cst = arith.constant 1.000000e+00 : f32
    %13 = vector.broadcast %cst : f32 to vector<16x128xf32>
    %14 = arith.addf %13, %12 : vector<16x128xf32>
    %15 = arith.divf %13, %14 : vector<16x128xf32>
    %16 = arith.mulf %10, %15 : vector<16x128xf32>
    %17 = arith.truncf %16 : vector<16x128xf32> to vector<16x128xbf16>
    %cst_7 = arith.constant 0.000000e+00 : bf16
    %18 = vector.broadcast %cst_7 : bf16 to vector<1x128xbf16>
    %19 = vector.extract_strided_slice %17 {offsets = [0, 0], sizes = [15, 128], strides = [1, 1]} : vector<16x128xbf16> to vector<15x128xbf16>
    %20 = tpu.concatenate %18, %19 in 0 : vector<1x128xbf16>, vector<15x128xbf16> -> vector<16x128xbf16>
    %21 = vector.extract_strided_slice %17 {offsets = [1, 0], sizes = [15, 128], strides = [1, 1]} : vector<16x128xbf16> to vector<15x128xbf16>
    %22 = tpu.concatenate %21, %18 in 0 : vector<15x128xbf16>, vector<1x128xbf16> -> vector<16x128xbf16>
    %23 = tpu.concatenate %20, %17, %22 in 1 : vector<16x128xbf16>, vector<16x128xbf16>, vector<16x128xbf16> -> vector<16x384xbf16>
    %c0_8 = arith.constant 0 : index
    %c0_9 = arith.constant 0 : index
    %24 = vector.load %arg4[%c0_8, %c0_9] : memref<384x128xbf16, #tpu.memory_space<vmem>>, vector<384x128xbf16>
    %cst_10 = arith.constant dense<0.000000e+00> : vector<16x128xf32>
    %25 = tpu.matmul %23, %24, %cst_10 {dimension_numbers = #tpu.dot_dimension_numbers<[1], [0], [0], [1], [0, 0, 1, 1], [], []>} : vector<16x384xbf16>, vector<384x128xbf16>, vector<16x128xf32> -> vector<16x128xf32>
    %c0_11 = arith.constant 0 : index
    %c0_12 = arith.constant 0 : index
    %26 = vector.load %arg5[%c0_11, %c0_12] : memref<1x128xf32, #tpu.memory_space<vmem>>, vector<1x128xf32>
    %27 = vector.broadcast %26 : vector<1x128xf32> to vector<16x128xf32>
    %28 = arith.addf %25, %27 : vector<16x128xf32>
    %c0_13 = arith.constant 0 : index
    %c0_14 = arith.constant 0 : index
    %c0_15 = arith.constant 0 : index
    %29 = vector.load %arg6[%c0_13, %c0_14, %c0_15] : memref<1x16x128xf32, #tpu.memory_space<vmem>>, vector<1x16x128xf32>
    %30 = vector.shape_cast %29 : vector<1x16x128xf32> to vector<16x128xf32>
    %31 = vector.shape_cast %28 : vector<16x128xf32> to vector<1x16x128xf32>
    tpu.vector_store %arg6[%c0_13, %c0_14, %c0_15], %31 {strides = array<i32>} : memref<1x16x128xf32, #tpu.memory_space<vmem>>, vector<1x16x128xf32>,
    %cst_16 = arith.constant dense<0.000000e+00> : vector<128xf32>
    %32 = vector.multi_reduction <add>, %28, %cst_16 [0] : vector<16x128xf32> to vector<128xf32>
    %33 = vector.shape_cast %32 : vector<128xf32> to vector<1x128xf32>
    %34 = arith.mulf %28, %28 : vector<16x128xf32>
    %cst_17 = arith.constant dense<0.000000e+00> : vector<128xf32>
    %35 = vector.multi_reduction <add>, %34, %cst_17 [0] : vector<16x128xf32> to vector<128xf32>
    %36 = vector.shape_cast %35 : vector<128xf32> to vector<1x128xf32>
    %c0_18 = arith.constant 0 : index
    %c0_19 = arith.constant 0 : index
    %37 = vector.load %arg7[%c0_18, %c0_19] : memref<2x128xf32, #tpu.memory_space<vmem>>, vector<2x128xf32>
    %38 = tpu.concatenate %33, %36 in 0 : vector<1x128xf32>, vector<1x128xf32> -> vector<2x128xf32>
    %39 = arith.addf %37, %38 : vector<2x128xf32>
    %c0_20 = arith.constant 0 : index
    %c0_21 = arith.constant 0 : index
    %40 = vector.load %arg7[%c0_20, %c0_21] : memref<2x128xf32, #tpu.memory_space<vmem>>, vector<2x128xf32>
    tpu.vector_store %arg7[%c0_20, %c0_21], %39 {strides = array<i32>} : memref<2x128xf32, #tpu.memory_space<vmem>>, vector<2x128xf32>,
    return
  }
  func.func @transform_0(%arg0: i32) -> (i32, i32, i32) {
    %c0_i32 = arith.constant 0 : i32
    %c0_i32_0 = arith.constant 0 : i32
    %c0_i32_1 = arith.constant 0 : i32
    return %arg0, %c0_i32, %c0_i32_0 : i32, i32, i32
  }
  func.func @transform_1(%arg0: i32) -> (i32, i32) {
    %c0_i32 = arith.constant 0 : i32
    %c0_i32_0 = arith.constant 0 : i32
    %c0_i32_1 = arith.constant 0 : i32
    return %c0_i32, %c0_i32_0 : i32, i32
  }
  func.func @transform_2(%arg0: i32) -> (i32, i32) {
    %c0_i32 = arith.constant 0 : i32
    %c0_i32_0 = arith.constant 0 : i32
    %c0_i32_1 = arith.constant 0 : i32
    return %c0_i32, %c0_i32_0 : i32, i32
  }
  func.func @transform_3(%arg0: i32) -> (i32, i32) {
    %c0_i32 = arith.constant 0 : i32
    %c0_i32_0 = arith.constant 0 : i32
    %c0_i32_1 = arith.constant 0 : i32
    return %c0_i32, %c0_i32_0 : i32, i32
  }
  func.func @transform_4(%arg0: i32) -> (i32, i32) {
    %c0_i32 = arith.constant 0 : i32
    %c0_i32_0 = arith.constant 0 : i32
    %c0_i32_1 = arith.constant 0 : i32
    return %c0_i32, %c0_i32_0 : i32, i32
  }
  func.func @transform_5(%arg0: i32) -> (i32, i32, i32) {
    %c0_i32 = arith.constant 0 : i32
    %c0_i32_0 = arith.constant 0 : i32
    %c0_i32_1 = arith.constant 0 : i32
    return %arg0, %c0_i32, %c0_i32_0 : i32, i32, i32
  }
  func.func @transform_6(%arg0: i32) -> (i32, i32) {
    %c0_i32 = arith.constant 0 : i32
    %c0_i32_0 = arith.constant 0 : i32
    %c0_i32_1 = arith.constant 0 : i32
    return %c0_i32, %c0_i32_0 : i32, i32
  }
}

module attributes {stable_mosaic.version = 11 : i64} {
  func.func @stage3_kernel(%arg0: i32, %arg1: memref<1x16x128xf32, #tpu.memory_space<vmem>>, %arg2: memref<1x128xf32, #tpu.memory_space<vmem>>, %arg3: memref<1x128xf32, #tpu.memory_space<vmem>>, %arg4: memref<1x16x128xf32, #tpu.memory_space<vmem>>) attributes {dimension_semantics = [#tpu.dimension_semantics<parallel>], iteration_bounds = array<i64: 2>, scalar_prefetch = 0 : i64, scratch_operands = 0 : i64, tpu.core_type = #tpu.core_type<tc>, window_params = [{transform_indices = @transform_0, window_bounds = array<i64: 1, 16, 128>}, {pipeline_mode = #tpu.pipeline_mode<synchronous>, transform_indices = @transform_1, window_bounds = array<i64: 1, 128>}, {pipeline_mode = #tpu.pipeline_mode<synchronous>, transform_indices = @transform_2, window_bounds = array<i64: 1, 128>}, {transform_indices = @transform_3, window_bounds = array<i64: 1, 16, 128>}]} {
    %c0 = arith.constant 0 : index
    %c0_0 = arith.constant 0 : index
    %c0_1 = arith.constant 0 : index
    %0 = vector.load %arg1[%c0, %c0_0, %c0_1] : memref<1x16x128xf32, #tpu.memory_space<vmem>>, vector<1x16x128xf32>
    %1 = vector.shape_cast %0 : vector<1x16x128xf32> to vector<16x128xf32>
    %c0_2 = arith.constant 0 : index
    %c0_3 = arith.constant 0 : index
    %2 = vector.load %arg2[%c0_2, %c0_3] : memref<1x128xf32, #tpu.memory_space<vmem>>, vector<1x128xf32>
    %3 = vector.broadcast %2 : vector<1x128xf32> to vector<16x128xf32>
    %4 = arith.mulf %1, %3 : vector<16x128xf32>
    %c0_4 = arith.constant 0 : index
    %c0_5 = arith.constant 0 : index
    %5 = vector.load %arg3[%c0_4, %c0_5] : memref<1x128xf32, #tpu.memory_space<vmem>>, vector<1x128xf32>
    %6 = vector.broadcast %5 : vector<1x128xf32> to vector<16x128xf32>
    %7 = arith.addf %4, %6 : vector<16x128xf32>
    %8 = arith.negf %7 : vector<16x128xf32>
    %9 = math.exp %8 : vector<16x128xf32>
    %cst = arith.constant 1.000000e+00 : f32
    %10 = vector.broadcast %cst : f32 to vector<16x128xf32>
    %11 = arith.addf %10, %9 : vector<16x128xf32>
    %12 = arith.divf %10, %11 : vector<16x128xf32>
    %13 = arith.mulf %7, %12 : vector<16x128xf32>
    %c0_6 = arith.constant 0 : index
    %c0_7 = arith.constant 0 : index
    %c0_8 = arith.constant 0 : index
    %14 = vector.load %arg4[%c0_6, %c0_7, %c0_8] : memref<1x16x128xf32, #tpu.memory_space<vmem>>, vector<1x16x128xf32>
    %15 = vector.shape_cast %14 : vector<1x16x128xf32> to vector<16x128xf32>
    %16 = vector.shape_cast %13 : vector<16x128xf32> to vector<1x16x128xf32>
    tpu.vector_store %arg4[%c0_6, %c0_7, %c0_8], %16 {strides = array<i32>} : memref<1x16x128xf32, #tpu.memory_space<vmem>>, vector<1x16x128xf32>,
    return
  }
  func.func @transform_0(%arg0: i32) -> (i32, i32, i32) {
    %c0_i32 = arith.constant 0 : i32
    %c0_i32_0 = arith.constant 0 : i32
    %c0_i32_1 = arith.constant 0 : i32
    return %arg0, %c0_i32, %c0_i32_0 : i32, i32, i32
  }
  func.func @transform_1(%arg0: i32) -> (i32, i32) {
    %c0_i32 = arith.constant 0 : i32
    %c0_i32_0 = arith.constant 0 : i32
    %c0_i32_1 = arith.constant 0 : i32
    return %c0_i32, %c0_i32_0 : i32, i32
  }
  func.func @transform_2(%arg0: i32) -> (i32, i32) {
    %c0_i32 = arith.constant 0 : i32
    %c0_i32_0 = arith.constant 0 : i32
    %c0_i32_1 = arith.constant 0 : i32
    return %c0_i32, %c0_i32_0 : i32, i32
  }
  func.func @transform_3(%arg0: i32) -> (i32, i32, i32) {
    %c0_i32 = arith.constant 0 : i32
    %c0_i32_0 = arith.constant 0 : i32
    %c0_i32_1 = arith.constant 0 : i32
    return %arg0, %c0_i32, %c0_i32_0 : i32, i32, i32
  }
}

</mosaic_0001>

<bundles_post_ra>
// kernel: tile.33
= control target key start
LH: loop header
LB: loop body
LE: loop exit
PB: predicated region body
PF: predicated region fallthrough
CT: control target
= control target key end

     0   :  { %s28_s0 = inlined_call_operand.vmem [shape: f32[8], index: 0, kind: input, shape index: {}]   ;;  %s29_s1 = inlined_call_operand.vmem [shape: f32[16,8], index: 1, kind: output, shape index: {}]  }
   0x1   :  { %v4_v0 = vld [vmem:[%s28_s0] ss:$0 sm:$0xff] }
   0x2   :  { %5 = vst [vmem:[%s29_s1] sm:$0xff] %v4_v0  ;;  %8 = vst [vmem:[%s29_s1 + $0x8] sm:$0xff] %v4_v0 }

// kernel: tile.34
= control target key start
LH: loop header
LB: loop body
LE: loop exit
PB: predicated region body
PF: predicated region fallthrough
CT: control target
= control target key end

     0   :  { %s133_s10 = smov 120   ;;  %s134_s11 = smov 104   ;;  %vm3_vm0 = vcmask 64512   ;;  %vm9_vm1 = vcmask 1048512   ;;  %vm15_vm2 = vcmask 982912   ;;  %vm21_vm3 = vcmask 917312   ;;  %s209_s0 = inlined_call_operand.vmem [shape: f32[16,8], index: 0, kind: input, shape index: {}]   ;;  %s210_s1 = inlined_call_operand.vmem [shape: f32[1,128], index: 1, kind: output, shape index: {}]  }
   0x1   :  { %v103_v0 = vld [vmem:[%s209_s0 + $0xf] sm:$0x1]   ;;  %v105_v1 = vld [vmem:[%s209_s0 + $0xd] sm:$0x1]   ;;  %v104_v2 = vld [vmem:[%s209_s0 + $0xe] sm:$0x1]  }
   0x2   :  { %7 = vrot.lane.b32.xlu0 %v103_v0, %s133_s10  ;;  %19 = vrot.lane.b32.xlu1 %v105_v1, %s134_s11  ;;  %v106_v3 = vld [vmem:[%s209_s0 + $0xc] sm:$0x1]   ;;  %s135_s16 = smov 112   ;;  %s136_s17 = smov 96   ;;  %v107_v4 = vld [vmem:[%s209_s0 + $0xb] sm:$0x1]  }
   0x3   :  { %v108_v5 = vld [vmem:[%s209_s0 + $0xa] sm:$0x1]   ;;  %v2_v6 = vld [vmem:[%s209_s0] sm:$0x1]   ;;  %s137_s24 = smov 88   ;;  %s138_s25 = smov 80  }
   0x4   :  { %4 = vst.msk [vmem:[#allocation0] sm:$0x1] %vm3_vm0, %v2_v6   ;;  %v109_v7 = vld [vmem:[%s209_s0 + $0x9] sm:$0x1]   ;;  %v110_v8 = vld [vmem:[%s209_s0 + $0x8] sm:$0x1]  }
   0x5   :  { %s139_s30 = smov 72   ;;  %s140_s2 = smov 64   ;;  %v111_v9 = vld [vmem:[%s209_s0 + $0x7] sm:$0x1]   ;;  %v112_v10 = vld [vmem:[%s209_s0 + $0x6] sm:$0x1]  }
   0x6   :  { %13 = vrot.lane.b32.xlu0 %v104_v2, %s135_s16  ;;  %25 = vrot.lane.b32.xlu1 %v106_v3, %s136_s17  ;;  %s141_s7 = smov 56   ;;  %s142_s8 = smov 48   ;;  %v113_v11 = vld [vmem:[%s209_s0 + $0x5] sm:$0x1]   ;;  %v114_v12 = vld [vmem:[%s209_s0 + $0x4] sm:$0x1]  }
   0x7   :  { %s143_s13 = smov 40   ;;  %s144_s14 = smov 32   ;;  %v115_v13 = vld [vmem:[%s209_s0 + $0x3] sm:$0x1]   ;;  %v116_v14 = vld [vmem:[%s209_s0 + $0x2] sm:$0x1]  }
   0x8   :  { %s145_s19 = smov 24   ;;  %s146_s20 = smov 16   ;;  %v117_v15 = vld [vmem:[%s209_s0 + $0x1] sm:$0x1]   ;;  %vm27_vm4 = vcmask 851712   ;;  %vm33_vm5 = vcmask 786112  }
   0x9   :  { %s147_s0 = smov 8   ;;  %vm39_vm6 = vcmask 720512   ;;  %vm45_vm7 = vcmask 654912   ;;  %vm51_vm8 = vcmask 589312   ;;  %vm57_vm9 = vcmask 523712  }
   0xa   :  { %31 = vrot.lane.b32.xlu0 %v107_v4, %s137_s24  ;;  %37 = vrot.lane.b32.xlu1 %v108_v5, %s138_s25  ;;  %vm63_vm10 = vcmask 458112   ;;  %vm69_vm11 = vcmask 392512   ;;  %vm75_vm12 = vcmask 326912   ;;  %vm81_vm13 = vcmask 261312  }
   0xb   :  { %vm87_vm14 = vcmask 195712   ;;  %vm93_vm15 = vcmask 130112  }
   0xe   :  { %43 = vrot.lane.b32.xlu0 %v109_v7, %s139_s30  ;;  %49 = vrot.lane.b32.xlu1 %v110_v8, %s140_s2 }
  0x12   :  { %55 = vrot.lane.b32.xlu0 %v111_v9, %s141_s7  ;;  %61 = vrot.lane.b32.xlu1 %v112_v10, %s142_s8 }
  0x16   :  { %67 = vrot.lane.b32.xlu0 %v113_v11, %s143_s13  ;;  %73 = vrot.lane.b32.xlu1 %v114_v12, %s144_s14 }
  0x1a   :  { %79 = vrot.lane.b32.xlu0 %v115_v13, %s145_s19  ;;  %85 = vrot.lane.b32.xlu1 %v116_v14, %s146_s20 }
  0x1e   :  { %91 = vrot.lane.b32.xlu0 %v117_v15, %s147_s0 }
  0x74   :  { %v8_v16 = vpop.permute.xlu0 %7   ;;  %v20_v17 = vpop.permute.xlu1 %19  }
  0x75   :  { %10 = vst.msk [vmem:[#allocation0] sm:$0x1] %vm9_vm1, %v8_v16  }
  0x78   :  { %v14_v18 = vpop.permute.xlu0 %13   ;;  %v26_v19 = vpop.permute.xlu1 %25  }
  0x79   :  { %16 = vst.msk [vmem:[#allocation0] sm:$0x1] %vm15_vm2, %v14_v18  }
  0x7a   :  { %22 = vst.msk [vmem:[#allocation0] sm:$0x1] %vm21_vm3, %v20_v17  }
  0x7b   :  { %28 = vst.msk [vmem:[#allocation0] sm:$0x1] %vm27_vm4, %v26_v19  }
  0x7c   :  { %v32_v20 = vpop.permute.xlu0 %31   ;;  %v38_v21 = vpop.permute.xlu1 %37  }
  0x7d   :  { %34 = vst.msk [vmem:[#allocation0] sm:$0x1] %vm33_vm5, %v32_v20  }
  0x7e   :  { %40 = vst.msk [vmem:[#allocation0] sm:$0x1] %vm39_vm6, %v38_v21  }
  0x80   :  { %v44_v22 = vpop.permute.xlu0 %43   ;;  %v50_v23 = vpop.permute.xlu1 %49  }
  0x81   :  { %46 = vst.msk [vmem:[#allocation0] sm:$0x1] %vm45_vm7, %v44_v22  }
  0x82   :  { %52 = vst.msk [vmem:[#allocation0] sm:$0x1] %vm51_vm8, %v50_v23  }
  0x84   :  { %v56_v24 = vpop.permute.xlu0 %55   ;;  %v62_v25 = vpop.permute.xlu1 %61  }
  0x85   :  { %58 = vst.msk [vmem:[#allocation0] sm:$0x1] %vm57_vm9, %v56_v24  }
  0x86   :  { %64 = vst.msk [vmem:[#allocation0] sm:$0x1] %vm63_vm10, %v62_v25  }
  0x88   :  { %v68_v26 = vpop.permute.xlu0 %67   ;;  %v74_v27 = vpop.permute.xlu1 %73  }
  0x89   :  { %70 = vst.msk [vmem:[#allocation0] sm:$0x1] %vm69_vm11, %v68_v26  }
  0x8a   :  { %76 = vst.msk [vmem:[#allocation0] sm:$0x1] %vm75_vm12, %v74_v27  }
  0x8c   :  { %v80_v28 = vpop.permute.xlu0 %79   ;;  %v86_v29 = vpop.permute.xlu1 %85  }
  0x8d   :  { %82 = vst.msk [vmem:[#allocation0] sm:$0x1] %vm81_vm13, %v80_v28  }
  0x8e   :  { %88 = vst.msk [vmem:[#allocation0] sm:$0x1] %vm87_vm14, %v86_v29  }
  0x90   :  { %v92_v30 = vpop.permute.xlu0 %91  }
  0x91   :  { %94 = vst.msk [vmem:[#allocation0] sm:$0x1] %vm93_vm15, %v92_v30  }
  0x98   :  { %v99_v31 = vld [vmem:[#allocation0] sm:$0x1] }
  0x99   :  { %102 = vst [vmem:[%s210_s1] sm:$0x1] %v99_v31 }

// kernel: basic_block.3
= control target key start
LH: loop header
LB: loop body
LE: loop exit
PB: predicated region body
PF: predicated region fallthrough
CT: control target
= control target key end

     0   :  { %s555_s15 = smov 0   ;;  %s628_s0 = inlined_call_operand.vmem [shape: bf16[2,16,64], index: 0, kind: input, shape index: {}]   ;;  %s629_s1 = inlined_call_operand.vmem [shape: bf16[192,128], index: 1, kind: input, shape index: {}]   ;;  %s630_s2 = inlined_call_operand.vmem [shape: f32[1,128], index: 2, kind: input, shape index: {}]   ;;  %s631_s3 = inlined_call_operand.vmem [shape: f32[2,16,128], index: 3, kind: output, shape index: {0}]   ;;  %s632_s4 = inlined_call_operand.vmem [shape: f32[2,128], index: 4, kind: output, shape index: {1}]  }
   0x1 LB: > { %s466_s16 = sadd.s32 4294967295, %s525_s15   ;;  %p470_p0 = scmp.ge.s32.totalorder %s525_s15, 1  ;;  %s525_s15 = sphi %s555_s15, %s15_s15  }
   0x2   : > { %p160_p1 = scmp.lt.s32.totalorder %s525_s15, 3 }
   0x4   : > { %p161_p2 = pnand %p470_p0, %p160_p1 }
   0x5   : > { %p186_p3 = scmp.lt.s32.totalorder (!%p161_p2), %s466_s16, 1  ;;  %p475_p4 = scmp.ne.s32.totalorder (!%p161_p2), %s466_s16, 0 }
   0x6   : > { %164 = sbr.rel (%p161_p2) target bundleno = 355 (0x163), region = 32 }
   0xb   : > { %s187_s17 = scalar_select %p186_p3, %s466_s16, 1 }
   0xc   : > { %200 = sbr.rel (%p475_p4) target bundleno = 19 (0x13), region = 36 }
   0xd   : > { %s493_s18 = sshll.u32 %s187_s17, 3  ;;  %s494_s19 = sshll.u32 %s187_s17, 4 }
   0xe   : > { %s190_s22 = scalar_lea.vmem %s628_s0, %s493_s18  ;;  %s569_s25 = scalar_lea.vmem %s631_s3, %s494_s19 }
  0x11   : > { %v527_v0 = vmov 0.0  }
  0x12   : > { %201 = vst [vmem:[%s632_s4] sm:$0x3] %v527_v0 }
  0x13 PF: > { %v506_v1 = vld [vmem:[%s190_s22] sm:$0xff]   ;;  %v507_v2 = vld [vmem:[%s629_s1 + $0x38] sm:$0xff]   ;;  %s528_s30 = smov 64   ;;  %v529_v3 = vmov 0   ;;  %v508_v5 = vld [vmem:[%s629_s1 + $0x30] sm:$0xff]   ;;  %vm224_vm0 = vcmask 1047552  }
  0x14   : > { %228 = vrot.lane.b32.xlu0 %v506_v1, %s528_s30  ;;  %341 = vmatprep.subr.bf16.mxu0 %v529_v3  ;;  %v210_v4 = vshrl.u32 %v506_v1, 16  ;;  %v213_v6 = vshll.u32 %v506_v1, 16  ;;  %v509_v9 = vld [vmem:[%s629_s1 + $0x28] sm:$0xff]   ;;  %v510_v11 = vld [vmem:[%s629_s1 + $0x20] sm:$0xff]   ;;  %vm225_vm1 = vsmask.f32 7424 }
  0x15   : > { %342 = vmatpush1.bf16.msra.mxu0 %v507_v2  ;;  %vm230_vm2 = vcmask 523264   ;;  %vm226_vm3 = vmand %vm224_vm0, %vm225_vm1  ;;  %v511_v13 = vld [vmem:[%s629_s1 + $0x18] sm:$0xff]   ;;  %v512_v15 = vld [vmem:[%s629_s1 + $0x10] sm:$0xff]   ;;  %vm217_vm4 = vcmask 1040384   ;;  %vm218_vm5 = vsmask.f32 256 }
  0x16   : > { %343 = vmatprep.subr.bf16.mxu0 %v529_v3  ;;  %v212_v7 = vrot.slane %v210_v4, 7  ;;  %v221_v10 = vrot.slane %v213_v6, 1  ;;  %v513_v16 = vld [vmem:[%s629_s1 + $0x8] sm:$0xff]   ;;  %v514_v17 = vld [vmem:[%s629_s1] sm:$0xff]   ;;  %v515_v18 = vld [vmem:[%s629_s1 + $0x58] sm:$0xff]  }
  0x17   : > { %v516_v19 = vld [vmem:[%s629_s1 + $0x50] sm:$0xff]   ;;  %v517_v20 = vld [vmem:[%s629_s1 + $0x48] sm:$0xff]   ;;  %v518_v21 = vld [vmem:[%s629_s1 + $0x40] sm:$0xff]  }
  0x18   : > { %v215_v8 = vor.u32 %v213_v6, %v212_v7  ;;  %v222_v12 = vor.u32 %v221_v10, %v210_v4  ;;  %vm219_vm6 = vmand %vm217_vm4, %vm218_vm5  ;;  %v477_v25 = vld [vmem:[%s630_s2] ss:$0 sm:$0xff] }
  0x19   : > { %344 = vmatpush1.bf16.msra.mxu0 %v508_v5  ;;  %v400_v48 = vld [vmem:[%s632_s4] sm:$0x3] }
  0x1a   : > { %345 = vmatprep.subr.bf16.mxu0 %v529_v3  ;;  %v227_v14 = vsel %vm226_vm3, %v222_v12, 0  ;;  %v220_v22 = vsel %vm219_vm6, 0, %v215_v8 }
  0x1b   : > { %490 = vmatprep.mubr.msk.bf16.mxu0 %vm230_vm2, %v227_v14 }
  0x1d   : > { %346 = vmatpush1.bf16.msra.mxu0 %v509_v9 }
  0x1e   : > { %347 = vmatprep.subr.bf16.mxu0 %v529_v3 }
  0x21   : > { %348 = vmatpush1.bf16.msra.mxu0 %v510_v11 }
  0x22   : > { %349 = vmatprep.subr.bf16.mxu0 %v529_v3 }
  0x25   : > { %350 = vmatpush1.bf16.msra.mxu0 %v511_v13 }
  0x26   : > { %351 = vmatprep.subr.bf16.mxu0 %v529_v3 }
  0x29   : > { %352 = vmatpush1.bf16.msra.mxu0 %v512_v15 }
  0x2a   : > { %353 = vmatprep.subr.bf16.mxu0 %v529_v3 }
  0x2d   : > { %354 = vmatpush1.bf16.msra.mxu0 %v513_v16 }
  0x2e   : > { %355 = vmatprep.subr.bf16.mxu0 %v529_v3 }
  0x31   : > { %356 = vmatpush1.bf16.msra.mxu0 %v514_v17 }
  0x32   : > { %365 = vmatprep.subr.bf16.mxu0 %v529_v3 }
  0x35   : > { %366 = vmatpush2.bf16.msra.mxu0 %v515_v18 }
  0x36   : > { %367 = vmatprep.subr.bf16.mxu0 %v529_v3 }
  0x39   : > { %368 = vmatpush2.bf16.msra.mxu0 %v516_v19 }
  0x3a   : > { %369 = vmatprep.subr.bf16.mxu0 %v529_v3 }
  0x3d   : > { %370 = vmatpush2.bf16.msra.mxu0 %v517_v20 }
  0x3e   : > { %371 = vmatprep.subr.bf16.mxu0 %v529_v3 }
  0x41   : > { %372 = vmatpush2.bf16.msra.mxu0 %v518_v21 }
  0x86   : > { %v229_v23 = vpop.permute.xlu0 %228 }
  0x87   : > { %v233_v24 = vsel %vm230_vm2, %v220_v22, %v229_v23 }
  0x88   : > { %374 = vmatmul.mubr.bf16.vlgmr.msra.gmra.mxu0 %v233_v24 }
 0x148   : > { %v375_v26 = vpop.f32.mrf.mxu0 }
 0x149   : > { %v376_v27 = vadd.f32 %v477_v25, %v375_v26 }
 0x14a   : > { %v377_v28 = vpop.f32.mrf.mxu0 }
 0x14b   : > { %382 = vst [vmem:[%s569_s25] sm:$0xff] %v376_v27  ;;  %v391_v32 = vmul.f32 %v376_v27, %v376_v27 }
 0x14c   : > { %v378_v29 = vpop.f32.mrf.mxu0 }
 0x14d   : > { %v379_v30 = vadd.f32 %v477_v25, %v378_v29 }
 0x14e   : > { %v380_v31 = vpop.f32.mrf.mxu0 }
 0x14f   : > { %383 = vst [vmem:[%s569_s25 + $0x8] sm:$0xff] %v379_v30  ;;  %v384_v33 = vadd.f32 %v379_v30, %v376_v27  ;;  %v392_v34 = vmul.f32 %v379_v30, %v379_v30 }
 0x151   : > { %v385_v35 = vrot.slane %v384_v33, 4  ;;  %v393_v36 = vadd.f32 %v392_v34, %v391_v32 }
 0x153   : > { %v386_v37 = vadd.f32 %v385_v35, %v384_v33  ;;  %v394_v38 = vrot.slane %v393_v36, 4 }
 0x155   : > { %v387_v39 = vrot.slane %v386_v37, 2  ;;  %v395_v40 = vadd.f32 %v394_v38, %v393_v36 }
 0x157   : > { %v388_v41 = vadd.f32 %v387_v39, %v386_v37  ;;  %v396_v42 = vrot.slane %v395_v40, 2 }
 0x159   : > { %v389_v43 = vrot.slane %v388_v41, 1  ;;  %v397_v44 = vadd.f32 %v396_v42, %v395_v40 }
 0x15b   : > { %v398_v45 = vrot.slane %v397_v44, 1  ;;  %v390_v46 = vadd.f32 %v389_v43, %v388_v41 }
 0x15d   : > { %v399_v47 = vadd.f32 %v398_v45, %v397_v44 }
 0x15f   : > { %v402_v49 = vsel %vm217_vm4, %v390_v46, %v399_v47 }
 0x160   : > { %v403_v50 = vadd.f32 %v402_v49, %v400_v48 }
 0x162   : > { %404 = vst [vmem:[%s632_s4] sm:$0x3] %v403_v50 }
 0x163 PF: > { %s15_s15 = sadd.s32 1, %s525_s15  }
 0x164   : > { %p12_p5 = scmp.ge.s32.totalorder %s15_s15, 4  }
 0x166   :  { %14 = sbr.rel (!%p12_p5) target bundleno = 1 (0x1), region = 74 }

// kernel: basic_block.5
= control target key start
LH: loop header
LB: loop body
LE: loop exit
PB: predicated region body
PF: predicated region fallthrough
CT: control target
= control target key end

     0   :  { %s323_s12 = smov 0   ;;  %s346_s0 = inlined_call_operand.vmem [shape: f32[2,16,128], index: 0, kind: input, shape index: {}]   ;;  %s347_s1 = inlined_call_operand.vmem [shape: f32[1,128], index: 1, kind: input, shape index: {}]   ;;  %s348_s2 = inlined_call_operand.vmem [shape: f32[1,128], index: 2, kind: input, shape index: {}]   ;;  %s349_s3 = inlined_call_operand.vmem [shape: f32[2,16,128], index: 3, kind: output, shape index: {}]  }
   0x1 LB: > { %s262_s13 = sadd.s32 4294967295, %s301_s12   ;;  %p266_p0 = scmp.ge.s32.totalorder %s301_s12, 1  ;;  %s301_s12 = sphi %s323_s12, %s13_s12  }
   0x2   : > { %p137_p1 = scmp.lt.s32.totalorder %s301_s12, 3 }
   0x4   : > { %p138_p2 = pnand %p266_p0, %p137_p1 }
   0x5   : > { %p161_p3 = scmp.lt.s32.totalorder (!%p138_p2), %s262_s13, 1 }
   0x6   : > { %141 = sbr.rel (%p138_p2) target bundleno = 55 (0x37), region = 32 }
   0xb   : > { %s351_s13 = smov (!%p161_p3, %s262_s13), 1  ;;  %v271_v0 = vld [vmem:[%s347_s1] ss:$0 sm:$0xff] }
   0xc   : > { %s277_s14 = sshll.u32 %s351_s13, 4  ;;  %v272_v3 = vld [vmem:[%s348_s2] ss:$0 sm:$0xff] }
   0xd   : > { %s165_s19 = scalar_lea.vmem %s346_s0, %s277_s14  ;;  %s170_s24 = scalar_lea.vmem %s349_s3, %s277_s14 }
   0xe   : > { %v171_v1 = vld [vmem:[%s165_s19] sm:$0xff]  ;;  %v172_v2 = vld [vmem:[%s165_s19 + $0x8] sm:$0xff] }
   0xf   : > { %v180_v4 = vmul.f32 %v271_v0, %v171_v1  ;;  %v181_v5 = vmul.f32 %v271_v0, %v172_v2 }
  0x11   : > { %v189_v6 = vadd.f32 %v272_v3, %v180_v4  ;;  %v190_v7 = vadd.f32 %v272_v3, %v181_v5 }
  0x13   : > { %v273_v8 = vmul.f32 -1.442695, %v189_v6  ;;  %v274_v9 = vmul.f32 -1.442695, %v190_v7 }
  0x15   : > { %287 = vpow2.f32 %v273_v8 }
  0x16   : > { %289 = vpow2.f32 %v274_v9 }
  0x22   : > { %v288_v10 = vpop.eup %287 }
  0x23   : > { %v290_v11 = vpop.eup %289  ;;  %v197_v12 = vadd.f32 1.0, %v288_v10 }
  0x24   : > { %v198_v13 = vadd.f32 1.0, %v290_v11 }
  0x25   : > { %291 = vrcp.f32 %v197_v12 }
  0x26   : > { %293 = vrcp.f32 %v198_v13 }
  0x32   : > { %v292_v14 = vpop.eup %291 }
  0x33   : > { %v294_v15 = vpop.eup %293  ;;  %v203_v16 = vmul.f32 %v292_v14, %v189_v6 }
  0x34   : > { %v204_v17 = vmul.f32 %v294_v15, %v190_v7 }
  0x35   : > { %205 = vst [vmem:[%s170_s24] sm:$0xff] %v203_v16 }
  0x36   : > { %206 = vst [vmem:[%s170_s24 + $0x8] sm:$0xff] %v204_v17 }
  0x37 PF: > { %s13_s12 = sadd.s32 1, %s301_s12  }
  0x38   : > { %p10_p4 = scmp.ge.s32.totalorder %s13_s12, 4  }
  0x3a   :  { %12 = sbr.rel (!%p10_p4) target bundleno = 1 (0x1), region = 62 }

// kernel: basic_block.4
= control target key start
LH: loop header
LB: loop body
LE: loop exit
PB: predicated region body
PF: predicated region fallthrough
CT: control target
= control target key end

     0   :  { %s858_s21 = smov 0   ;;  %s975_s0 = inlined_call_operand.vmem [shape: f32[2,16,128], index: 0, kind: input, shape index: {}]   ;;  %s976_s1 = inlined_call_operand.vmem [shape: f32[1,128], index: 1, kind: input, shape index: {}]   ;;  %s977_s2 = inlined_call_operand.vmem [shape: f32[1,128], index: 2, kind: input, shape index: {}]   ;;  %s978_s3 = inlined_call_operand.vmem [shape: bf16[384,128], index: 3, kind: input, shape index: {}]   ;;  %s979_s4 = inlined_call_operand.vmem [shape: f32[1,128], index: 4, kind: input, shape index: {}]   ;;  %s980_s5 = inlined_call_operand.vmem [shape: f32[2,16,128], index: 5, kind: output, shape index: {0}]   ;;  %s981_s6 = inlined_call_operand.vmem [shape: f32[2,128], index: 6, kind: output, shape index: {1}]  }
   0x1 LB: > { %s675_s22 = sadd.s32 4294967295, %s818_s21   ;;  %p679_p0 = scmp.ge.s32.totalorder %s818_s21, 1  ;;  %s818_s21 = sphi %s858_s21, %s17_s21  }
   0x2   : > { %p210_p1 = scmp.lt.s32.totalorder %s818_s21, 3 }
   0x4   : > { %p211_p2 = pnand %p679_p0, %p210_p1 }
   0x5   : > { %p240_p3 = scmp.lt.s32.totalorder (!%p211_p2), %s675_s22, 1  ;;  %p684_p4 = scmp.ne.s32.totalorder (!%p211_p2), %s675_s22, 0 }
   0x6   : > { %214 = sbr.rel (%p211_p2) target bundleno = 301 (0x12d), region = 40 }
   0xb   : > { %s241_s23 = scalar_select %p240_p3, %s675_s22, 1 }
   0xc   : > { %254 = sbr.rel (%p684_p4) target bundleno = 19 (0x13), region = 44 }
   0xd   : > { %s716_s24 = sshll.u32 %s241_s23, 4 }
   0xe   : > { %s869_s27 = scalar_lea.vmem %s975_s0, %s716_s24  ;;  %s874_s30 = scalar_lea.vmem %s980_s5, %s716_s24 }
  0x11   : > { %v820_v0 = vmov 0.0  }
  0x12   : > { %255 = vst [vmem:[%s981_s6] sm:$0x3] %v820_v0 }
  0x13 PF: > { %v780_v1 = vld [vmem:[%s978_s3 + $0x78] sm:$0xff]   ;;  %v821_v2 = vmov 0.0   ;;  %vm822_vm0 = vmmov 0   ;;  %v783_v5 = vld [vmem:[%s978_s3 + $0x70] sm:$0xff]   ;;  %v786_v8 = vld [vmem:[%s978_s3 + $0x68] sm:$0xff]   ;;  %vm299_vm1 = vcmask 1040384  }
  0x14   : > { %749 = vmatprep.subr.bf16.mxu1 %v821_v2  ;;  %v781_v3 = vld [vmem:[%s978_s3 + $0x38] sm:$0xff]   ;;  %718 = vmatprep.subr.bf16.mxu0 %v780_v1  ;;  %v784_v6 = vld [vmem:[%s978_s3 + $0x30] sm:$0xff]   ;;  %v787_v9 = vld [vmem:[%s978_s3 + $0x28] sm:$0xff]   ;;  %vm300_vm2 = vsmask.f32 256  ;;  %vm306_vm3 = vcmask 1047552  }
  0x15   : > { %v782_v4 = vld [vmem:[%s978_s3 + $0xb8] sm:$0xff]   ;;  %765 = vmatprep.mubr.msk.bf16.mxu1 %vm822_vm0, %v821_v2  ;;  %719 = vmatpush3.bf16.msra.mxu0 %v781_v3  ;;  %v785_v7 = vld [vmem:[%s978_s3 + $0xb0] sm:$0xff]   ;;  %v788_v10 = vld [vmem:[%s978_s3 + $0xa8] sm:$0xff]   ;;  %vm307_vm4 = vsmask.f32 7424 }
  0x16   : > { %750 = vmatpush3.bf16.msra.mxu1 %v782_v4  ;;  %720 = vmatprep.subr.bf16.mxu0 %v783_v5  ;;  %v789_v11 = vld [vmem:[%s978_s3 + $0x60] sm:$0xff]   ;;  %v792_v14 = vld [vmem:[%s978_s3 + $0x58] sm:$0xff]   ;;  %v795_v17 = vld [vmem:[%s978_s3 + $0x50] sm:$0xff]  }
  0x17   : > { %751 = vmatprep.subr.bf16.mxu1 %v821_v2  ;;  %v790_v12 = vld [vmem:[%s978_s3 + $0x20] sm:$0xff]   ;;  %v793_v15 = vld [vmem:[%s978_s3 + $0x18] sm:$0xff]   ;;  %v796_v18 = vld [vmem:[%s978_s3 + $0x10] sm:$0xff]  }
  0x18   : > { %v791_v13 = vld [vmem:[%s978_s3 + $0xa0] sm:$0xff]   ;;  %v794_v16 = vld [vmem:[%s978_s3 + $0x98] sm:$0xff]   ;;  %v797_v19 = vld [vmem:[%s978_s3 + $0x90] sm:$0xff]  }
  0x19   : > { %721 = vmatpush3.bf16.msra.mxu0 %v784_v6  ;;  %v798_v20 = vld [vmem:[%s978_s3 + $0x48] sm:$0xff]   ;;  %v801_v23 = vld [vmem:[%s978_s3 + $0x40] sm:$0xff]   ;;  %vm301_vm5 = vmand %vm299_vm1, %vm300_vm2 }
  0x1a   : > { %752 = vmatpush3.bf16.msra.mxu1 %v785_v7  ;;  %722 = vmatprep.subr.bf16.mxu0 %v786_v8  ;;  %v799_v21 = vld [vmem:[%s978_s3 + $0x8] sm:$0xff]   ;;  %v256_v24 = vld [vmem:[%s869_s27] sm:$0xff]  ;;  %vm308_vm6 = vmand %vm306_vm3, %vm307_vm4 }
  0x1b   : > { %753 = vmatprep.subr.bf16.mxu1 %v821_v2  ;;  %v800_v22 = vld [vmem:[%s978_s3 + $0x88] sm:$0xff]   ;;  %v685_v26 = vld [vmem:[%s976_s1] ss:$0 sm:$0xff] }
  0x1c   : > { %v257_v25 = vld [vmem:[%s869_s27 + $0x8] sm:$0xff]  ;;  %v265_v27 = vmul.f32 %v685_v26, %v256_v24  ;;  %v686_v29 = vld [vmem:[%s977_s2] ss:$0 sm:$0xff] }
  0x1d   : > { %723 = vmatpush3.bf16.msra.mxu0 %v787_v9  ;;  %v266_v28 = vmul.f32 %v685_v26, %v257_v25  ;;  %v802_v30 = vld [vmem:[%s978_s3] sm:$0xff]  }
  0x1e   : > { %754 = vmatpush3.bf16.msra.mxu1 %v788_v10  ;;  %724 = vmatprep.subr.bf16.mxu0 %v789_v11  ;;  %v274_v31 = vadd.f32 %v686_v29, %v265_v27  ;;  %v803_v33 = vld [vmem:[%s978_s3 + $0x80] sm:$0xff]  }
  0x1f   : > { %755 = vmatprep.subr.bf16.mxu1 %v821_v2  ;;  %v275_v32 = vadd.f32 %v686_v29, %v266_v28  ;;  %v689_v55 = vld [vmem:[%s979_s4] ss:$0 sm:$0xff] }
  0x20   : > { %v687_v34 = vmul.f32 -1.442695, %v274_v31 }
  0x21   : > { %725 = vmatpush3.bf16.msra.mxu0 %v790_v12  ;;  %v688_v35 = vmul.f32 -1.442695, %v275_v32 }
  0x22   : > { %756 = vmatpush3.bf16.msra.mxu1 %v791_v13  ;;  %726 = vmatprep.subr.bf16.mxu0 %v792_v14  ;;  %804 = vpow2.f32 %v687_v34 }
  0x23   : > { %757 = vmatprep.subr.bf16.mxu1 %v821_v2  ;;  %806 = vpow2.f32 %v688_v35 }
  0x25   : > { %727 = vmatpush3.bf16.msra.mxu0 %v793_v15 }
  0x26   : > { %758 = vmatpush3.bf16.msra.mxu1 %v794_v16  ;;  %728 = vmatprep.subr.bf16.mxu0 %v795_v17 }
  0x27   : > { %759 = vmatprep.subr.bf16.mxu1 %v821_v2 }
  0x29   : > { %729 = vmatpush3.bf16.msra.mxu0 %v796_v18 }
  0x2a   : > { %760 = vmatpush3.bf16.msra.mxu1 %v797_v19  ;;  %730 = vmatprep.subr.bf16.mxu0 %v798_v20  ;;  %v609_v20 = vld [vmem:[%s981_s6] sm:$0x3] }
  0x2b   : > { %761 = vmatprep.subr.bf16.mxu1 %v821_v2 }
  0x2d   : > { %731 = vmatpush3.bf16.msra.mxu0 %v799_v21 }
  0x2e   : > { %762 = vmatpush3.bf16.msra.mxu1 %v800_v22  ;;  %732 = vmatprep.subr.bf16.mxu0 %v801_v23 }
  0x2f   : > { %763 = vmatprep.subr.bf16.mxu1 %v821_v2  ;;  %v805_v36 = vpop.eup %804 }
  0x30   : > { %v807_v37 = vpop.eup %806  ;;  %v282_v38 = vadd.f32 1.0, %v805_v36 }
  0x31   : > { %733 = vmatpush3.bf16.msra.mxu0 %v802_v30  ;;  %v283_v39 = vadd.f32 1.0, %v807_v37 }
  0x32   : > { %764 = vmatpush3.bf16.msra.mxu1 %v803_v33  ;;  %808 = vrcp.f32 %v282_v38 }
  0x33   : > { %810 = vrcp.f32 %v283_v39 }
  0x3f   : > { %v809_v40 = vpop.eup %808 }
  0x40   : > { %v811_v41 = vpop.eup %810  ;;  %v288_v42 = vmul.f32 %v809_v40, %v274_v31 }
  0x41   : > { %v289_v43 = vmul.f32 %v811_v41, %v275_v32 }
  0x43   : > { %v290_v44 = vpack.c.bf16 %v289_v43, %v288_v42 }
  0x45   : > { %541 = vmatprep.mubr.bf16.mxu0 %v290_v44  ;;  %v292_v45 = vshrl.u32 %v290_v44, 16  ;;  %v295_v46 = vshll.u32 %v290_v44, 16 }
  0x47   : > { %v294_v47 = vrot.slane %v292_v45, 7  ;;  %v303_v48 = vrot.slane %v295_v46, 1 }
  0x49   : > { %v297_v49 = vor.u32 %v295_v46, %v294_v47  ;;  %v304_v50 = vor.u32 %v303_v48, %v292_v45 }
  0x4b   : > { %v302_v51 = vsel %vm301_vm5, 0, %v297_v49  ;;  %v309_v52 = vsel %vm308_vm6, %v304_v50, 0 }
  0x4c   : > { %542 = vmatmul.mubr.bf16.vlgmr.msra.gmra.mxu0 %v302_v51  ;;  %766 = vmatmul.mubr.bf16.vlgmr.msra.gmra.mxu1 %v309_v52 }
 0x10c   : > { %v734_v53 = vpop.f32.mrf.mxu0  ;;  %v584_v54 = vpop.f32.mrf.mxu1 }
 0x10e   : > { %v735_v56 = vpop.f32.mrf.mxu0  ;;  %v767_v57 = vpop.f32.mrf.mxu1 }
 0x10f   : > { %v736_v58 = vadd.f32 %v735_v56, %v734_v53 }
 0x110   : > { %v737_v59 = vpop.f32.mrf.mxu0  ;;  %v587_v60 = vpop.f32.mrf.mxu1 }
 0x111   : > { %v544_v61 = vadd.f32 %v736_v58, %v689_v55 }
 0x112   : > { %v738_v62 = vpop.f32.mrf.mxu0  ;;  %v768_v63 = vpop.f32.mrf.mxu1 }
 0x113   : > { %v585_v0 = vadd.f32 %v584_v54, %v544_v61  ;;  %v739_v1 = vadd.f32 %v738_v62, %v737_v59 }
 0x115   : > { %591 = vst [vmem:[%s874_s30] sm:$0xff] %v585_v0  ;;  %v547_v2 = vadd.f32 %v739_v1, %v689_v55  ;;  %v600_v4 = vmul.f32 %v585_v0, %v585_v0 }
 0x117   : > { %v588_v3 = vadd.f32 %v587_v60, %v547_v2 }
 0x119   : > { %592 = vst [vmem:[%s874_s30 + $0x8] sm:$0xff] %v588_v3  ;;  %v593_v5 = vadd.f32 %v588_v3, %v585_v0  ;;  %v601_v6 = vmul.f32 %v588_v3, %v588_v3 }
 0x11b   : > { %v594_v7 = vrot.slane %v593_v5, 4  ;;  %v602_v8 = vadd.f32 %v601_v6, %v600_v4 }
 0x11d   : > { %v595_v9 = vadd.f32 %v594_v7, %v593_v5  ;;  %v603_v10 = vrot.slane %v602_v8, 4 }
 0x11f   : > { %v596_v11 = vrot.slane %v595_v9, 2  ;;  %v604_v12 = vadd.f32 %v603_v10, %v602_v8 }
 0x121   : > { %v597_v13 = vadd.f32 %v596_v11, %v595_v9  ;;  %v605_v14 = vrot.slane %v604_v12, 2 }
 0x123   : > { %v598_v15 = vrot.slane %v597_v13, 1  ;;  %v606_v16 = vadd.f32 %v605_v14, %v604_v12 }
 0x125   : > { %v607_v17 = vrot.slane %v606_v16, 1  ;;  %v599_v18 = vadd.f32 %v598_v15, %v597_v13 }
 0x127   : > { %v608_v19 = vadd.f32 %v607_v17, %v606_v16 }
 0x129   : > { %v611_v21 = vsel %vm299_vm1, %v599_v18, %v608_v19 }
 0x12a   : > { %v612_v22 = vadd.f32 %v611_v21, %v609_v20 }
 0x12c   : > { %613 = vst [vmem:[%s981_s6] sm:$0x3] %v612_v22 }
 0x12d PF: > { %s17_s21 = sadd.s32 1, %s818_s21  }
 0x12e   : > { %p14_p5 = scmp.ge.s32.totalorder %s17_s21, 4  }
 0x130   :  { %16 = sbr.rel (!%p14_p5) target bundleno = 1 (0x1), region = 82 }

</bundles_post_ra>
